<compile_context>
chip_gen: v7x
topology: tpu7x:2x2x1
jax: 0.10.0
libtpu: 0.0.40
codegen_flags: <defaults>
</compile_context>

<pallas_src>
import functools

import jax
import jax.numpy as jnp
from jax.experimental import pallas as pl
from jax.experimental.pallas import tpu as pltpu

K = 3                      # conv kernel size
_IM2COL_MAX_C = 128        # below this, fuse the 3 taps into one matmul (K = 3*C)


def _taps(a, l_idx):
    """prev/cur/next copies of `a` along axis 1 (length L) with zeroed edges.

    Implements the pad=1 halo of a k=3 conv with XLU rolls + a select mask instead
    of sublane-offset slices/concats.  (shift = L-1 is a roll-by(-1) without relying
    on negative-shift support.)
    """
    L = a.shape[1]
    prev = jnp.where(l_idx > 0, pltpu.roll(a, shift=1, axis=1), 0)
    nxt = jnp.where(l_idx < L - 1, pltpu.roll(a, shift=L - 1, axis=1), 0)
    return prev, a, nxt


def _conv3(a, w_ref, l_idx, cdt, fuse_im2col):
    """3-tap, stride-1, pad-1 conv along axis 1 of a = (TB, L, C).

    w_ref is the im2col-layout weight ref (3*C, Cout) with the BN scale folded in.
    Returns an f32 (TB*L, Cout) accumulator.
    """
    TB, L, C = a.shape
    t0, t1, t2 = _taps(a, l_idx)
    if fuse_im2col:
        # Small C: 3*C still underfills the MXU contraction dim -> one fused matmul.
        cat = jnp.concatenate(
            [t0.astype(cdt), t1.astype(cdt), t2.astype(cdt)], axis=2
        ).reshape(TB * L, K * C)
        return jnp.dot(cat, w_ref[...], preferred_element_type=jnp.float32)
    # Large C: MXU K dim is already full per tap -> 3 accumulating matmuls.
    acc = jnp.dot(t0.astype(cdt).reshape(TB * L, C), w_ref[0:C, :],
                  preferred_element_type=jnp.float32)
    acc += jnp.dot(t1.astype(cdt).reshape(TB * L, C), w_ref[C:2 * C, :],
                   preferred_element_type=jnp.float32)
    acc += jnp.dot(t2.astype(cdt).reshape(TB * L, C), w_ref[2 * C:3 * C, :],
                   preferred_element_type=jnp.float32)
    return acc


def _basic_block_kernel(x_ref, w1_ref, b1_ref, w2_ref, b2_ref, o_ref, *,
                        fuse_im2col):
    # x_ref : (TB, Cin, L)   native PyTorch layout block
    # w1_ref: (3*Cin, Cout)  conv1 weights, im2col (tap-major) layout, BN1 scale folded
    # b1_ref: (1, Cout)      folded BN1 bias (f32)
    # w2_ref: (3*Cout, Cout) conv2 weights, BN2 scale folded
    # b2_ref: (1, Cout)      folded BN2 bias (f32)
    # o_ref : (TB, Cout, L)
    TB, cin, L = x_ref.shape
    cout = o_ref.shape[1]
    cdt = w1_ref.dtype                               # matmul operand dtype (bf16/f32)

    # In-kernel relayout to channels-last (XLU transpose of the tile; no HBM pass).
    x_nlc = jnp.transpose(x_ref[...], (0, 2, 1))     # (TB, L, Cin), input dtype

    l_idx = jax.lax.broadcasted_iota(jnp.int32, (1, L, 1), 1)

    # ---- conv1 (+ folded BN1 scale) + bias + relu (f32 epilogue) ----
    h1 = _conv3(x_nlc, w1_ref, l_idx, cdt, fuse_im2col)
    h1 = jnp.maximum(h1 + b1_ref[...], 0.0)          # (TB*L, Cout), f32

    # ---- conv2 (+ folded BN2 scale), no VMEM scratch round trip ----
    h2 = _conv3(h1.reshape(TB, L, cout), w2_ref, l_idx, cdt, fuse_im2col)

    # ---- BN2 bias + identity residual + relu, all f32 ----
    res = x_nlc.astype(jnp.float32).reshape(TB * L, cin)
    out = jnp.maximum(h2 + b2_ref[...] + res, 0.0)   # (TB*L, Cout)

    # Back to native (TB, Cout, L): lane dim = L -> lane-dense store for real L.
    o_ref[...] = jnp.transpose(out.reshape(TB, L, cout), (0, 2, 1)).astype(o_ref.dtype)


def _vmem_limit_bytes():
    """Generation-aware scoped-VMEM limit: half of physical, capped at 64 MiB."""
    try:
        phys = int(pltpu.get_tpu_info().vmem_capacity_bytes)
    except Exception:                      # query unavailable -> assume smallest (v7x)
        phys = 64 * 1024 * 1024
    return min(phys // 2, 64 * 1024 * 1024)


@functools.partial(jax.jit, static_argnames=("eps", "batch_tile", "compute_dtype"))
def basic_block_1d(x, w1, g1, b1, m1, v1, w2, g2, b2, m2, v2,
                   eps=1e-5, batch_tile=8, compute_dtype=jnp.bfloat16):
    """x: (N, C, L) float32 -- same layout/semantics as the PyTorch module (eval BN).

    Matmul operands default to bf16 (MXU-native on v5e/v6e/v7x); accumulation,
    the bias/residual/relu epilogue and the output stay f32.  Pass
    compute_dtype=jnp.float32 for a bit-tight reference path.
    """
    N, Cin, L = x.shape
    Cout = w1.shape[0]
    assert Cin == Cout, "stride=1 / downsample=None path requires inplanes == planes"
    # TODO(synk): stride>1 / downsample branch of BasicBlock1D is not implemented
    #             (the module's default construction uses stride=1, downsample=None).

    # ---- generation-aware VMEM budget & batch tile ----
    vmem_limit = _vmem_limit_bytes()
    cbytes = 2 if compute_dtype == jnp.bfloat16 else 4
    cmax = max(Cin, Cout)
    # per-batch-element in-flight bytes: double-buffered in/out blocks (f32) plus a
    # handful of tile-sized f32 / compute-dtype temporaries (taps, h1, accumulators).
    per_elem = 2 * 2 * L * (Cin + Cout) * 4 + L * cmax * (4 * 4 + 4 * cbytes)
    budget = vmem_limit // 2                       # headroom for compiler scratch/spills
    tb = max(1, min(batch_tile, N, budget // max(per_elem, 1)))
    if N >= 2:                                     # grid >= 2 steps: megacore + pipelining
        tb = min(tb, pl.cdiv(N, 2))
    n_pad = pl.cdiv(N, tb) * tb                    # masked tail via cheap batch padding
    # TODO(synk): for very long sequences additionally tile L (grid axis with a 1-row
    #             carried halo) instead of whole-L blocks.

    # ---- BN folding into the conv weights (host-side, tiny) ----
    inv1 = g1 / jnp.sqrt(v1 + eps)
    inv2 = g2 / jnp.sqrt(v2 + eps)
    # im2col weight layout: rows ordered [tap0 | tap1 | tap2] x Cin.
    w1_cat = (jnp.transpose(w1, (2, 1, 0)).reshape(K * Cin, Cout)
              * inv1[None, :]).astype(compute_dtype)
    w2_cat = (jnp.transpose(w2, (2, 1, 0)).reshape(K * Cout, Cout)
              * inv2[None, :]).astype(compute_dtype)
    bias1 = (b1 - m1 * inv1).reshape(1, Cout).astype(jnp.float32)
    bias2 = (b2 - m2 * inv2).reshape(1, Cout).astype(jnp.float32)

    x_in = x if n_pad == N else jnp.pad(x, ((0, n_pad - N), (0, 0), (0, 0)))

    fuse_im2col = Cin < _IM2COL_MAX_C
    full2 = lambda b: (0, 0)

    # (On v6e/v5e, deeper prefetch via pipeline_mode=pl.Buffered(3) on the x spec is an
    #  option for long grids; left at the default double buffering here.)
    out = pl.pallas_call(
        functools.partial(_basic_block_kernel, fuse_im2col=fuse_im2col),
        out_shape=jax.ShapeDtypeStruct((n_pad, Cout, L), x.dtype),
        grid=(n_pad // tb,),
        in_specs=[
            pl.BlockSpec((tb, Cin, L), lambda b: (b, 0, 0)),
            pl.BlockSpec((K * Cin, Cout), full2),
            pl.BlockSpec((1, Cout), full2),
            pl.BlockSpec((K * Cout, Cout), full2),
            pl.BlockSpec((1, Cout), full2),
        ],
        out_specs=pl.BlockSpec((tb, Cout, L), lambda b: (b, 0, 0)),
        compiler_params=pltpu.CompilerParams(
            dimension_semantics=("parallel",),
            vmem_limit_bytes=vmem_limit),
    )(x_in, w1_cat, bias1, w2_cat, bias2)

    return out if n_pad == N else out[:N]


def _reference(x, w1, g1, b1, m1, v1, w2, g2, b2, m2, v2, eps=1e-5):
    """Pure-JAX reference matching PyTorch eval-mode semantics."""
    def conv(a, w):
        return jax.lax.conv_general_dilated(
            a, w, window_strides=(1,), padding=[(1, 1)],
            dimension_numbers=("NCH", "OIH", "NCH"))

    def bn(a, g, b, m, v):
        g, b, m, v = (t[None, :, None] for t in (g, b, m, v))
        return (a - m) / jnp.sqrt(v + eps) * g + b

    out = jax.nn.relu(bn(conv(x, w1), g1, b1, m1, v1))
    out = bn(conv(out, w2), g2, b2, m2, v2)
    return jax.nn.relu(out + x)


if __name__ == "__main__":
    N, C, L = 4, 8, 16   # batch, channels (inplanes == planes), sequence length

    key = jax.random.PRNGKey(0)
    ks = jax.random.split(key, 11)
    w1 = jax.random.normal(ks[0], (C, C, K), jnp.float32) * 0.1   # (Cout, Cin, K)
    w2 = jax.random.normal(ks[1], (C, C, K), jnp.float32) * 0.1
    g1 = 1.0 + 0.1 * jax.random.normal(ks[2], (C,), jnp.float32)
    b1 = 0.1 * jax.random.normal(ks[3], (C,), jnp.float32)
    m1 = 0.1 * jax.random.normal(ks[4], (C,), jnp.float32)
    v1 = jnp.abs(jax.random.normal(ks[5], (C,), jnp.float32)) + 0.5
    g2 = 1.0 + 0.1 * jax.random.normal(ks[6], (C,), jnp.float32)
    b2 = 0.1 * jax.random.normal(ks[7], (C,), jnp.float32)
    m2 = 0.1 * jax.random.normal(ks[8], (C,), jnp.float32)
    v2 = jnp.abs(jax.random.normal(ks[9], (C,), jnp.float32)) + 0.5
    x = jax.random.normal(ks[10], (N, C, L), jnp.float32)

    args = (x, w1, g1, b1, m1, v1, w2, g2, b2, m2, v2)
    ref = _reference(*args)

    # f32 matmul path: tight check against the PyTorch-equivalent reference.
    out_f32 = jax.block_until_ready(basic_block_1d(*args, compute_dtype=jnp.float32))
    assert out_f32.shape == (N, C, L)
    err32 = float(jnp.max(jnp.abs(out_f32 - ref)))
    assert err32 < 1e-4, f"f32 path max abs err {err32}"

    # Default bf16-operand path (f32 accumulate / epilogue): loose tolerance.
    out_bf16 = jax.block_until_ready(basic_block_1d(*args))
    assert out_bf16.shape == (N, C, L)
    errbf = float(jnp.max(jnp.abs(out_bf16 - ref)))
    assert errbf < 5e-2, f"bf16 path max abs err {errbf}"

    print("KERNEL_OK")
</pallas_src>

<mosaic_0001>
module attributes {stable_mosaic.version = 11 : i64} {
  func.func @_basic_block_kernel(%arg0: i32, %arg1: memref<2x8x16xf32, #tpu.memory_space<vmem>>, %arg2: memref<24x8xf32, #tpu.memory_space<vmem>>, %arg3: memref<1x8xf32, #tpu.memory_space<vmem>>, %arg4: memref<24x8xf32, #tpu.memory_space<vmem>>, %arg5: memref<1x8xf32, #tpu.memory_space<vmem>>, %arg6: memref<2x8x16xf32, #tpu.memory_space<vmem>>) attributes {dimension_semantics = [#tpu.dimension_semantics<parallel>], iteration_bounds = array<i64: 2>, scalar_prefetch = 0 : i64, scratch_operands = 0 : i64, tpu.core_type = #tpu.core_type<tc>, window_params = [{transform_indices = @transform_0, window_bounds = array<i64: 2, 8, 16>}, {pipeline_mode = #tpu.pipeline_mode<synchronous>, transform_indices = @transform_1, window_bounds = array<i64: 24, 8>}, {pipeline_mode = #tpu.pipeline_mode<synchronous>, transform_indices = @transform_2, window_bounds = array<i64: 1, 8>}, {pipeline_mode = #tpu.pipeline_mode<synchronous>, transform_indices = @transform_3, window_bounds = array<i64: 24, 8>}, {pipeline_mode = #tpu.pipeline_mode<synchronous>, transform_indices = @transform_4, window_bounds = array<i64: 1, 8>}, {transform_indices = @transform_5, window_bounds = array<i64: 2, 8, 16>}]} {
    %c0 = arith.constant 0 : index
    %c0_0 = arith.constant 0 : index
    %c0_1 = arith.constant 0 : index
    %0 = vector.load %arg1[%c0, %c0_0, %c0_1] : memref<2x8x16xf32, #tpu.memory_space<vmem>>, vector<2x8x16xf32>
    %1 = tpu.transpose %0, [0, 2, 1] : vector<2x8x16xf32> -> vector<2x16x8xf32>
    %2 = tpu.iota {dimensions = array<i32: 1>} : vector<1x16x1xi32>
    %c0_i32 = arith.constant 0 : i32
    %3 = vector.broadcast %c0_i32 : i32 to vector<1x16x1xi32>
    %4 = arith.cmpi sgt, %2, %3 : vector<1x16x1xi32>
    %c1_i32 = arith.constant 1 : i32
    %5 = tpu.dynamic_rotate %1 by %c1_i32 dim 1 : vector<2x16x8xf32>, i32 -> vector<2x16x8xf32>
    %c0_i32_2 = arith.constant 0 : i32
    %6 = arith.sitofp %c0_i32_2 : i32 to f32
    %7 = vector.shape_cast %4 : vector<1x16x1xi1> to vector<1x16x1xi1>
    %8 = vector.broadcast %7 : vector<1x16x1xi1> to vector<2x16x8xi1>
    %9 = vector.broadcast %6 : f32 to vector<2x16x8xf32>
    %10 = arith.select %8, %5, %9 : vector<2x16x8xi1>, vector<2x16x8xf32>
    %c15_i32 = arith.constant 15 : i32
    %11 = vector.broadcast %c15_i32 : i32 to vector<1x16x1xi32>
    %12 = arith.cmpi slt, %2, %11 : vector<1x16x1xi32>
    %c15_i32_3 = arith.constant 15 : i32
    %13 = tpu.dynamic_rotate %1 by %c15_i32_3 dim 1 : vector<2x16x8xf32>, i32 -> vector<2x16x8xf32>
    %c0_i32_4 = arith.constant 0 : i32
    %14 = arith.sitofp %c0_i32_4 : i32 to f32
    %15 = vector.shape_cast %12 : vector<1x16x1xi1> to vector<1x16x1xi1>
    %16 = vector.broadcast %15 : vector<1x16x1xi1> to vector<2x16x8xi1>
    %17 = vector.broadcast %14 : f32 to vector<2x16x8xf32>
    %18 = arith.select %16, %13, %17 : vector<2x16x8xi1>, vector<2x16x8xf32>
    %19 = tpu.concatenate %10, %1, %18 in 2 : vector<2x16x8xf32>, vector<2x16x8xf32>, vector<2x16x8xf32> -> vector<2x16x24xf32>
    %20 = vector.shape_cast %19 : vector<2x16x24xf32> to vector<32x24xf32>
    %c0_5 = arith.constant 0 : index
    %c0_6 = arith.constant 0 : index
    %21 = vector.load %arg2[%c0_5, %c0_6] : memref<24x8xf32, #tpu.memory_space<vmem>>, vector<24x8xf32>
    %cst = arith.constant dense<0.000000e+00> : vector<32x8xf32>
    %22 = tpu.matmul %20, %21, %cst {dimension_numbers = #tpu.dot_dimension_numbers<[1], [0], [0], [1], [0, 0, 1, 1], [], []>} : vector<32x24xf32>, vector<24x8xf32>, vector<32x8xf32> -> vector<32x8xf32>
    %c0_7 = arith.constant 0 : index
    %c0_8 = arith.constant 0 : index
    %23 = vector.load %arg3[%c0_7, %c0_8] : memref<1x8xf32, #tpu.memory_space<vmem>>, vector<1x8xf32>
    %24 = vector.broadcast %23 : vector<1x8xf32> to vector<32x8xf32>
    %25 = arith.addf %22, %24 : vector<32x8xf32>
    %cst_9 = arith.constant 0.000000e+00 : f32
    %26 = vector.broadcast %cst_9 : f32 to vector<32x8xf32>
    %27 = arith.maximumf %25, %26 : vector<32x8xf32>
    %28 = vector.shape_cast %27 : vector<32x8xf32> to vector<2x16x8xf32>
    %c0_i32_10 = arith.constant 0 : i32
    %29 = vector.broadcast %c0_i32_10 : i32 to vector<1x16x1xi32>
    %30 = arith.cmpi sgt, %2, %29 : vector<1x16x1xi32>
    %c1_i32_11 = arith.constant 1 : i32
    %31 = tpu.dynamic_rotate %28 by %c1_i32_11 dim 1 : vector<2x16x8xf32>, i32 -> vector<2x16x8xf32>
    %c0_i32_12 = arith.constant 0 : i32
    %32 = arith.sitofp %c0_i32_12 : i32 to f32
    %33 = vector.shape_cast %30 : vector<1x16x1xi1> to vector<1x16x1xi1>
    %34 = vector.broadcast %33 : vector<1x16x1xi1> to vector<2x16x8xi1>
    %35 = vector.broadcast %32 : f32 to vector<2x16x8xf32>
    %36 = arith.select %34, %31, %35 : vector<2x16x8xi1>, vector<2x16x8xf32>
    %c15_i32_13 = arith.constant 15 : i32
    %37 = vector.broadcast %c15_i32_13 : i32 to vector<1x16x1xi32>
    %38 = arith.cmpi slt, %2, %37 : vector<1x16x1xi32>
    %c15_i32_14 = arith.constant 15 : i32
    %39 = tpu.dynamic_rotate %28 by %c15_i32_14 dim 1 : vector<2x16x8xf32>, i32 -> vector<2x16x8xf32>
    %c0_i32_15 = arith.constant 0 : i32
    %40 = arith.sitofp %c0_i32_15 : i32 to f32
    %41 = vector.shape_cast %38 : vector<1x16x1xi1> to vector<1x16x1xi1>
    %42 = vector.broadcast %41 : vector<1x16x1xi1> to vector<2x16x8xi1>
    %43 = vector.broadcast %40 : f32 to vector<2x16x8xf32>
    %44 = arith.select %42, %39, %43 : vector<2x16x8xi1>, vector<2x16x8xf32>
    %45 = tpu.concatenate %36, %28, %44 in 2 : vector<2x16x8xf32>, vector<2x16x8xf32>, vector<2x16x8xf32> -> vector<2x16x24xf32>
    %46 = vector.shape_cast %45 : vector<2x16x24xf32> to vector<32x24xf32>
    %c0_16 = arith.constant 0 : index
    %c0_17 = arith.constant 0 : index
    %47 = vector.load %arg4[%c0_16, %c0_17] : memref<24x8xf32, #tpu.memory_space<vmem>>, vector<24x8xf32>
    %cst_18 = arith.constant dense<0.000000e+00> : vector<32x8xf32>
    %48 = tpu.matmul %46, %47, %cst_18 {dimension_numbers = #tpu.dot_dimension_numbers<[1], [0], [0], [1], [0, 0, 1, 1], [], []>} : vector<32x24xf32>, vector<24x8xf32>, vector<32x8xf32> -> vector<32x8xf32>
    %49 = vector.shape_cast %1 : vector<2x16x8xf32> to vector<32x8xf32>
    %c0_19 = arith.constant 0 : index
    %c0_20 = arith.constant 0 : index
    %50 = vector.load %arg5[%c0_19, %c0_20] : memref<1x8xf32, #tpu.memory_space<vmem>>, vector<1x8xf32>
    %51 = vector.broadcast %50 : vector<1x8xf32> to vector<32x8xf32>
    %52 = arith.addf %48, %51 : vector<32x8xf32>
    %53 = arith.addf %52, %49 : vector<32x8xf32>
    %cst_21 = arith.constant 0.000000e+00 : f32
    %54 = vector.broadcast %cst_21 : f32 to vector<32x8xf32>
    %55 = arith.maximumf %53, %54 : vector<32x8xf32>
    %56 = vector.shape_cast %55 : vector<32x8xf32> to vector<2x16x8xf32>
    %57 = tpu.transpose %56, [0, 2, 1] : vector<2x16x8xf32> -> vector<2x8x16xf32>
    %c0_22 = arith.constant 0 : index
    %c0_23 = arith.constant 0 : index
    %c0_24 = arith.constant 0 : index
    %58 = vector.load %arg6[%c0_22, %c0_23, %c0_24] : memref<2x8x16xf32, #tpu.memory_space<vmem>>, vector<2x8x16xf32>
    tpu.vector_store %arg6[%c0_22, %c0_23, %c0_24], %57 {strides = array<i32>} : memref<2x8x16xf32, #tpu.memory_space<vmem>>, vector<2x8x16xf32>,
    return
  }
  func.func @transform_0(%arg0: i32) -> (i32, i32, i32) {
    %c0_i32 = arith.constant 0 : i32
    %c0_i32_0 = arith.constant 0 : i32
    %c0_i32_1 = arith.constant 0 : i32
    return %arg0, %c0_i32, %c0_i32_0 : i32, i32, i32
  }
  func.func @transform_1(%arg0: i32) -> (i32, i32) {
    %c0_i32 = arith.constant 0 : i32
    %c0_i32_0 = arith.constant 0 : i32
    %c0_i32_1 = arith.constant 0 : i32
    return %c0_i32, %c0_i32_0 : i32, i32
  }
  func.func @transform_2(%arg0: i32) -> (i32, i32) {
    %c0_i32 = arith.constant 0 : i32
    %c0_i32_0 = arith.constant 0 : i32
    %c0_i32_1 = arith.constant 0 : i32
    return %c0_i32, %c0_i32_0 : i32, i32
  }
  func.func @transform_3(%arg0: i32) -> (i32, i32) {
    %c0_i32 = arith.constant 0 : i32
    %c0_i32_0 = arith.constant 0 : i32
    %c0_i32_1 = arith.constant 0 : i32
    return %c0_i32, %c0_i32_0 : i32, i32
  }
  func.func @transform_4(%arg0: i32) -> (i32, i32) {
    %c0_i32 = arith.constant 0 : i32
    %c0_i32_0 = arith.constant 0 : i32
    %c0_i32_1 = arith.constant 0 : i32
    return %c0_i32, %c0_i32_0 : i32, i32
  }
  func.func @transform_5(%arg0: i32) -> (i32, i32, i32) {
    %c0_i32 = arith.constant 0 : i32
    %c0_i32_0 = arith.constant 0 : i32
    %c0_i32_1 = arith.constant 0 : i32
    return %arg0, %c0_i32, %c0_i32_0 : i32, i32, i32
  }
}

</mosaic_0001>

<bundles_post_ra>
// kernel: basic_block_1d.1
= control target key start
LH: loop header
LB: loop body
LE: loop exit
PB: predicated region body
PF: predicated region fallthrough
CT: control target
= control target key end

     0   :  { %10 = vsyncpa [#allocation3], 0  ;;  %s1268_s0 = inlined_call_operand.vmem [shape: f32[4,8,16], index: 0, kind: input, shape index: {}]   ;;  %s1269_s1 = inlined_call_operand.vmem [shape: f32[24,8], index: 1, kind: input, shape index: {}]   ;;  %s1270_s2 = inlined_call_operand.vmem [shape: f32[1,8], index: 2, kind: input, shape index: {}]   ;;  %s1271_s3 = inlined_call_operand.vmem [shape: f32[24,8], index: 3, kind: input, shape index: {}]   ;;  %s1272_s4 = inlined_call_operand.vmem [shape: f32[1,8], index: 4, kind: input, shape index: {}]   ;;  %s1273_s5 = inlined_call_operand.hbm [shape: f32[4,8,16], index: 5, kind: output, shape index: {}]  }
   0x1   :  { %12 = vsyncpa [#allocation3 + $0x1], 0  ;;  %s1018_s18 = smov 0   ;;  %s1020_s19 = smov 0  }
   0x2   :  { %s1022_s20 = smov 0   ;;  %s1024_s21 = smov 0  }
   0x3 LB: > { %s1039_s22 = sadd.s32 4294967295, %s982_s21   ;;  %s808_s23 = sadd.s32 4294967294, %s982_s21   ;;  %s982_s21 = sphi %s1024_s21, %s1279_s21   ;;  %s978_s20 = sphi %s1022_s20, %s1278_s20   ;;  %s974_s19 = sphi %s1020_s19, %s1277_s19   ;;  %s970_s18 = sphi %s1018_s18, %s1276_s18  }
   0x4   : > { %s1043_s24 = sadd.s32 1, %s982_s21   ;;  %s135_s25 = sadd.s32 1, %s978_s20 }
   0x5   : > { %s132_s26 = ssub.s32 %s982_s21, %s1043_s24  ;;  %p145_p0 = scmp.ne.s32.totalorder %s978_s20, %s974_s19 }
   0x6   : > { %p133_p1 = scmp.eq.s32.totalorder %s132_s26, 0  ;;  %p146_p2 = scmp.eq.s32.totalorder %s1039_s22, 1 }
   0x7   : > { %p151_p3 = scmp.ne.s32.totalorder %s974_s19, %s970_s18  ;;  %p152_p4 = scmp.eq.s32.totalorder %s808_s23, 1 }
   0x8   : > { %s1054_s27 = scalar_select %p133_p1, %s978_s20, %s135_s25  }
   0x9   : > { %p1056_p5 = por %p146_p2, %p145_p0  ;;  %p1060_p6 = por %p152_p4, %p151_p3 }
   0xa   : > { %p811_p7 = scmp.ge.s32.totalorder %s982_s21, 1  ;;  %p191_p8 = scmp.lt.s32.totalorder %s982_s21, 3 }
   0xc   : > { %p192_p9 = pnand %p811_p7, %p191_p8 }
   0xd   : > { %s813_s30 = sshll.u32 (!%p192_p9), %s1039_s22, 1  ;;  %v375_v2 = vld [vmem:[%s1269_s1] sm:$0xff] (!%p192_p9)  ;;  %v376_v3 = vld [vmem:[%s1269_s1 + $0x8] sm:$0xff] (!%p192_p9)  ;;  %v292_v5 = vlaneseq (!%p192_p9)  ;;  %v377_v6 = vld [vmem:[%s1269_s1 + $0x10] sm:$0xff] (!%p192_p9)  ;;  %s984_s16 = smov (!%p192_p9), 8   ;;  %vm365_vm4 = vcmask (!%p192_p9), 64512  }
   0xe   : > { %195 = sbr.rel (%p192_p9) target bundleno = 1002 (0x3ea), region = 40  ;;  %p220_p10 = scmp.lt.s32.totalorder (!%p192_p9), %s813_s30, 3  ;;  %v869_v4 = vpack.c.bf16 (!%p192_p9), %v376_v3, %v375_v2  ;;  %vm370_vm5 = vcmask (!%p192_p9), 130048   ;;  %vm385_vm6 = vcmask (!%p192_p9), 195584   ;;  %v815_v49 = vld [vmem:[%s1270_s2] ss:$0 sm:$0xff] (!%p192_p9) }
   0xf   : > { %v1079_v7 = vshrl.u32 (!%p192_p9), %v292_v5, 7  ;;  %s985_s17 = smov (!%p192_p9), 16   ;;  %v551_v53 = vld [vmem:[%s1271_s3] sm:$0xff] (!%p192_p9)  ;;  %v552_v54 = vld [vmem:[%s1271_s3 + $0x8] sm:$0xff] (!%p192_p9)  ;;  %v553_v63 = vld [vmem:[%s1271_s3 + $0x10] sm:$0xff] (!%p192_p9)  ;;  %s216_s12 = sand.u32 (!%p192_p9), 1, %s974_s19  }
  0x10   : > { %870 = vmatprep.subr.bf16.mxu0 (!%p192_p9), %v869_v4  ;;  %v873_v56 = vpack.c.bf16 (!%p192_p9), %v552_v54, %v551_v53  ;;  %s812_s13 = sshll.u32 (!%p192_p9), %s216_s12, 4 }
  0x11   : > { %872 = vmatpush3.bf16.msra.mxu0 (!%p192_p9), %v869_v4  ;;  %v1086_v9 = vadd.s32 (!%p192_p9), 8, %v1079_v7  ;;  %vm320_vm0 = vcmp.lt.s32.totalorder (!%p192_p9), %v1079_v7, 7  ;;  %vm301_vm2 = vcmp.lt.s32.totalorder (!%p192_p9), %v1079_v7, 1  ;;  %vm295_vm3 = vcmp.gt.s32.totalorder (!%p192_p9), %v1079_v7, 0  ;;  %s218_s14 = scalar_lea.vmem (!%p192_p9), [#allocation2], %s812_s13 }
  0x12   : > { %849 = vmatprep.subr.mxu0 (!%p192_p9), %v377_v6  ;;  %874 = vmatprep.subr.bf16.mxu1 (!%p192_p9), %v873_v56  ;;  %s746_s15 = sshll.u32 (!%p192_p9), %s218_s14, 4  ;;  %s1218_s15 = int_to_ptr.vmem [resolvable:$true] %s746_s15 }
  0x13   : > { %vm315_vm1 = vcmp.lt.s32.totalorder (!%p192_p9), %v1086_v9, 15  ;;  %876 = vmatpush3.bf16.msra.mxu1 (!%p192_p9), %v873_v56 }
  0x14   : > { %861 = vmatprep.subr.mxu1 (!%p192_p9), %v553_v63 }
  0x15   : > { %s1281_s30 = smov (!%p220_p10, %s813_s30), 3  ;;  %850 = vmatpush3.msra.mxu0 %v377_v6 }
  0x16   : > { %s814_s6 = sshll.u32 %s1281_s30, 3  ;;  %s1226_s30 = scalar_lea.sflag [#allocation3], %s216_s12 }
  0x17   : > { %s223_s9 = scalar_lea.vmem %s1268_s0, %s814_s6  ;;  %862 = vmatpush3.msra.mxu1 %v553_v63  ;;  %s920_s6 = scalar_lea.vmem %s1218_s15, 256 }
  0x18   : > { %v226_v0 = vld [vmem:[%s223_s9] sm:$0xff]  ;;  %v227_v1 = vld [vmem:[%s223_s9 + $0x8] sm:$0xff]  ;;  %p921_p11 = scmp.ne.s32.totalorder %s1218_s15, %s920_s6 }
  0x19   : > { %228 = vxpose.xlu0.b32.start.end [1/1] (short) (narrow) %v226_v0, 16 }
  0x1a   : > { %p922_p12 = pnand %p921_p11, %p1056_p5 }
  0x1c   : > { %p923_p13 = pneg %p922_p12 }
  0x1e   : > { %260 = vxpose.xlu0.b32.start.end [1/1] (short) (narrow) %v227_v1, 16 }
  0x99   : > { %v1081_v8 = vpop.trf.xlu0 }
  0x9a   : > { %337 = vrot.lane.b32.xlu1 %v1081_v8, %s984_s16  ;;  %v316_v11 = vrot.slane %v1081_v8, 1  ;;  %v297_v25 = vrot.slane %v1081_v8, 7 }
  0x9d   : > { %v1088_v10 = vpop.trf.xlu0 }
  0x9e   : > { %v318_v12 = vrot.slane %v1088_v10, 1  ;;  %339 = vrot.lane.b32.xlu1 %v1088_v10, %s984_s16  ;;  %v299_v23 = vrot.slane %v1088_v10, 7 }
  0xa0   : > { %v323_v13 = vsel %vm320_vm0, %v318_v12, %v316_v11  ;;  %v321_v14 = vsel %vm320_vm0, %v316_v11, %v318_v12  ;;  %v304_v26 = vsel %vm301_vm2, %v299_v23, %v297_v25  ;;  %v302_v29 = vsel %vm301_vm2, %v297_v25, %v299_v23 }
  0xa1   : > { %v1100_v15 = vpop.trf.xlu0  ;;  %v330_v16 = vsel %vm315_vm1, %v323_v13, 0.0  ;;  %v310_v28 = vsel %vm295_vm3, %v304_v26, 0.0 }
  0xa2   : > { %355 = vrot.lane.b32.xlu0 %v330_v16, %s985_s17  ;;  %353 = vrot.lane.b32.xlu1 %v321_v14, %s985_s17  ;;  %v317_v18 = vrot.slane %v1100_v15, 1  ;;  %v298_v36 = vrot.slane %v1100_v15, 7 }
  0xa5   : > { %v1106_v17 = vpop.trf.xlu0 }
  0xa6   : > { %341 = vrot.lane.b32.xlu1 %v1100_v15, %s984_s16  ;;  %v319_v19 = vrot.slane %v1106_v17, 1  ;;  %v300_v37 = vrot.slane %v1106_v17, 7 }
  0xa8   : > { %v322_v20 = vsel %vm320_vm0, %v317_v18, %v319_v19  ;;  %v324_v21 = vsel %vm320_vm0, %v319_v19, %v317_v18  ;;  %v305_v39 = vsel %vm301_vm2, %v300_v37, %v298_v36  ;;  %v303_v45 = vsel %vm301_vm2, %v298_v36, %v300_v37 }
  0xa9   : > { %v332_v22 = vsel %vm315_vm1, %v324_v21, 0.0  ;;  %v312_v41 = vsel %vm295_vm3, %v305_v39, 0.0 }
  0xaa   : > { %343 = vrot.lane.b32.xlu1 %v1106_v17, %s984_s16 }
  0xae   : > { %357 = vrot.lane.b32.xlu1 %v322_v20, %s985_s17 }
  0xb2   : > { %359 = vrot.lane.b32.xlu1 %v332_v22, %s985_s17 }
 0x10c   : > { %v338_v24 = vpop.permute.xlu1 %337 }
 0x10d   : > { %v366_v30 = vsel %vm365_vm4, %v310_v28, %v338_v24 }
 0x110   : > { %v340_v27 = vpop.permute.xlu1 %339 }
 0x111   : > { %v367_v31 = vsel %vm365_vm4, %v302_v29, %v340_v27 }
 0x114   : > { %v354_v32 = vpop.permute.xlu1 %353  ;;  %v356_v33 = vpop.permute.xlu0 %355 }
 0x115   : > { %v372_v34 = vsel %vm370_vm5, %v367_v31, %v356_v33  ;;  %v371_v35 = vsel %vm370_vm5, %v366_v30, %v354_v32 }
 0x116   : > { %851 = vmatprep.mubr.msk.f32.mxu0 %vm385_vm6, %v371_v35 }
 0x117   : > { %852 = vmatmul.mubr.msk.f32.vlgmr.msra.gmra.mrb[0].mxu0 %vm385_vm6, %v372_v34 }
 0x118   : > { %v342_v38 = vpop.permute.xlu1 %341 }
 0x119   : > { %v368_v42 = vsel %vm365_vm4, %v312_v41, %v342_v38 }
 0x11c   : > { %v344_v40 = vpop.permute.xlu1 %343 }
 0x11d   : > { %v369_v46 = vsel %vm365_vm4, %v303_v45, %v344_v40 }
 0x120   : > { %v358_v43 = vpop.permute.xlu1 %357 }
 0x121   : > { %v373_v44 = vsel %vm370_vm5, %v368_v42, %v358_v43  ;;  %v820_v43 = vld [vmem:[%s1272_s4] ss:$0 sm:$0xff] }
 0x122   : > { %854 = vmatprep.mubr.msk.f32.mxu0 %vm385_vm6, %v373_v44 }
 0x124   : > { %v360_v47 = vpop.permute.xlu1 %359 }
 0x125   : > { %v374_v48 = vsel %vm370_vm5, %v369_v46, %v360_v47 }
 0x126   : > { %855 = vmatmul.mubr.msk.f32.gmra.mrb[2].mxu0 %vm385_vm6, %v374_v48 }
 0x1ea   : > { %v853_v50 = vpop.f32.mrb[0].mxu0 }
 0x1eb   : > { %v470_v51 = vadd.f32 %v853_v50, %v815_v49  ;;  %v464_v52 = vpop.f32.mrb[1].mxu0 }
 0x1ec   : > { %v465_v55 = vadd.f32 %v815_v49, %v464_v52 }
 0x1ed   : > { %v484_v57 = vmax.f32 %v470_v51, 0.0 }
 0x1ee   : > { %v483_v58 = vmax.f32 %v465_v55, 0.0 }
 0x1ef   : > { %v489_v59 = vrot.slane %v484_v57, 7  ;;  %v501_v60 = vrot.slane %v484_v57, 1  ;;  %517 = vrot.lane.b32.xlu1 %v484_v57, %s984_s16 }
 0x1f0   : > { %v487_v61 = vrot.slane %v483_v58, 7  ;;  %v499_v62 = vrot.slane %v483_v58, 1 }
 0x1f2   : > { %v503_v0 = vsel %vm320_vm0, %v499_v62, %v501_v60  ;;  %v505_v1 = vsel %vm320_vm0, %v501_v60, %v499_v62  ;;  %v491_v2 = vsel %vm301_vm2, %v487_v61, %v489_v59  ;;  %v493_v3 = vsel %vm301_vm2, %v489_v59, %v487_v61 }
 0x1f3   : > { %515 = vrot.lane.b32.xlu1 %v483_v58, %s984_s16  ;;  %v508_v20 = vsel %vm315_vm1, %v505_v1, 0.0  ;;  %v495_v28 = vsel %vm295_vm3, %v493_v3, 0.0 }
 0x1f7   : > { %531 = vrot.lane.b32.xlu1 %v503_v0, %s985_s17 }
 0x1f9   : > { %v856_v4 = vpop.f32.mrb[2].mxu0 }
 0x1fa   : > { %v480_v5 = vadd.f32 %v856_v4, %v815_v49  ;;  %v474_v6 = vpop.f32.mrb[3].mxu0 }
 0x1fb   : > { %v475_v11 = vadd.f32 %v815_v49, %v474_v6 }
 0x1fc   : > { %v486_v12 = vmax.f32 %v480_v5, 0.0 }
 0x1fd   : > { %v485_v13 = vmax.f32 %v475_v11, 0.0 }
 0x1fe   : > { %v490_v14 = vrot.slane %v486_v12, 7  ;;  %v502_v16 = vrot.slane %v486_v12, 1  ;;  %521 = vrot.lane.b32.xlu1 %v486_v12, %s984_s16 }
 0x1ff   : > { %v488_v18 = vrot.slane %v485_v13, 7  ;;  %v500_v19 = vrot.slane %v485_v13, 1 }
 0x201   : > { %v506_v21 = vsel %vm320_vm0, %v502_v16, %v500_v19  ;;  %v504_v22 = vsel %vm320_vm0, %v500_v19, %v502_v16  ;;  %v492_v23 = vsel %vm301_vm2, %v488_v18, %v490_v14  ;;  %v494_v24 = vsel %vm301_vm2, %v490_v14, %v488_v18 }
 0x202   : > { %533 = vrot.lane.b32.xlu1 %v508_v20, %s985_s17  ;;  %v510_v25 = vsel %vm315_vm1, %v506_v21, 0.0  ;;  %v497_v37 = vsel %vm295_vm3, %v494_v24, 0.0 }
 0x203   : > { %537 = vrot.lane.b32.xlu0 %v510_v25, %s985_s17 }
 0x206   : > { %519 = vrot.lane.b32.xlu1 %v485_v13, %s984_s16 }
 0x20a   : > { %535 = vrot.lane.b32.xlu1 %v504_v22, %s985_s17  ;;  %s830_s17 = sshll.u32 %s1039_s22, 8  ;;  %s986_s22 = smov [#allocation2]  }
 0x20b   : > { %s1223_s26 = scalar_lea.hbm %s1273_s5, %s830_s17  ;;  %s924_s7 = sshll.u32 %s986_s22, 4  ;;  %s925_s7 = int_to_ptr.vmem [resolvable:$false] %s924_s7 }
 0x20c   : > { %s926_s8 = scalar_lea.vmem %s925_s7, 512  ;;  %p927_p0 = scmp.lt.s32.totalorder %s1218_s15, %s925_s7 }
 0x20d   : > { %p928_p1 = scmp.lt.s32.totalorder %s926_s8, %s920_s6 }
 0x20f   : > { %p929_p2 = por %p928_p1, %p927_p0 }
 0x211   : > { %p930_p3 = pnand %p929_p2, %p923_p13 }
 0x261   : > { %v518_v26 = vpop.permute.xlu1 %517 }
 0x262   : > { %v544_v32 = vsel %vm365_vm4, %v491_v2, %v518_v26 }
 0x265   : > { %v516_v27 = vpop.permute.xlu1 %515 }
 0x266   : > { %v543_v29 = vsel %vm365_vm4, %v495_v28, %v516_v27 }
 0x269   : > { %v532_v30 = vpop.permute.xlu1 %531 }
 0x26a   : > { %v547_v31 = vsel %vm370_vm5, %v543_v29, %v532_v30 }
 0x26b   : > { %863 = vmatprep.mubr.msk.f32.mxu1 %vm385_vm6, %v547_v31 }
 0x270   : > { %v522_v9 = vpop.permute.xlu1 %521 }
 0x271   : > { %v546_v40 = vsel %vm365_vm4, %v492_v23, %v522_v9 }
 0x274   : > { %v534_v33 = vpop.permute.xlu1 %533 }
 0x275   : > { %v548_v34 = vsel %vm370_vm5, %v544_v32, %v534_v33  ;;  %v538_v36 = vpop.permute.xlu0 %537 }
 0x276   : > { %864 = vmatmul.mubr.msk.f32.vlgmr.msra.gmra.mrb[0].mxu1 %vm385_vm6, %v548_v34  ;;  %v550_v42 = vsel %vm370_vm5, %v546_v40, %v538_v36 }
 0x278   : > { %v520_v35 = vpop.permute.xlu1 %519 }
 0x279   : > { %v545_v38 = vsel %vm365_vm4, %v497_v37, %v520_v35 }
 0x27c   : > { %v536_v39 = vpop.permute.xlu1 %535 }
 0x27d   : > { %v549_v41 = vsel %vm370_vm5, %v545_v38, %v536_v39 }
 0x27e   : > { %866 = vmatprep.mubr.msk.f32.mxu1 %vm385_vm6, %v549_v41 }
 0x27f   : > { %867 = vmatmul.mubr.msk.f32.gmra.mrb[2].mxu1 %vm385_vm6, %v550_v42 }
 0x349   : > { %v865_v44 = vpop.f32.mrb[0].mxu1 }
 0x34a   : > { %v639_v7 = vpop.f32.mrb[1].mxu1  ;;  %v645_v45 = vadd.f32 %v865_v44, %v820_v43 }
 0x34b   : > { %v640_v46 = vadd.f32 %v820_v43, %v639_v7 }
 0x34c   : > { %v659_v48 = vadd.f32 %v645_v45, %v1088_v10 }
 0x34d   : > { %v658_v47 = vadd.f32 %v640_v46, %v1081_v8 }
 0x34e   : > { %v663_v51 = vmax.f32 %v659_v48, 0.0 }
 0x34f   : > { %v662_v49 = vmax.f32 %v658_v47, 0.0 }
 0x351   : > { %666 = vxpose.xlu1.b32.start [1/2] (short) (narrow) %v662_v49, 8 }
 0x352   : > { %v868_v50 = vpop.f32.mrb[2].mxu1 }
 0x353   : > { %v649_v52 = vpop.f32.mrb[3].mxu1  ;;  %v655_v53 = vadd.f32 %v868_v50, %v820_v43 }
 0x354   : > { %v650_v54 = vadd.f32 %v820_v43, %v649_v52 }
 0x355   : > { %667 = vxpose.xlu1.b32.end [2/2] (short) (narrow) %v663_v51, 8  ;;  %v661_v56 = vadd.f32 %v655_v53, %v1106_v17 }
 0x356   : > { %v660_v55 = vadd.f32 %v650_v54, %v1100_v15 }
 0x357   : > { %v665_v58 = vmax.f32 %v661_v56, 0.0 }
 0x358   : > { %v664_v57 = vmax.f32 %v660_v55, 0.0 }
 0x35a   : > { %698 = vxpose.xlu0.b32.start [1/2] (short) (narrow) %v664_v57, 8 }
 0x35e   : > { %699 = vxpose.xlu0.b32.end [2/2] (short) (narrow) %v665_v58, 8 }
 0x3d1   : > { %v682_v8 = vpop.trf.xlu1 }
 0x3d2   : > { %730 = vst.msk [vmem:[%s218_s14] sm:$0xff] %vm370_vm5, %v682_v8 }
 0x3da   : > { %v714_v10 = vpop.trf.xlu0 }
 0x3db   : > { %731 = vst.msk [vmem:[%s218_s14 + $0x8] sm:$0xff] %vm370_vm5, %v714_v10 }
 0x3dc   : > { %933 = shalt.err (!%p930_p3)
}
 0x3dd   : > { %s934_s9 = scalar_lea.hbm %s1223_s26, 256  ;;  %s938_s12 = scalar_lea.hbm %s1273_s5, 512 }
 0x3de   : > { %p935_p4 = scmp.ne.s32.totalorder %s1223_s26, %s934_s9  ;;  %p939_p9 = scmp.lt.u32.totalorder %s1223_s26, %s1273_s5 }
 0x3df   : > { %p940_p10 = scmp.lt.u32.totalorder %s938_s12, %s934_s9  ;;  %p942_p12 = scmp.lt.u32.totalorder %s934_s9, %s1223_s26 }
 0x3e0   : > { %p936_p7 = pnand %p935_p4, %p1056_p5 }
 0x3e1   : > { %p941_p11 = por %p940_p10, %p939_p9 }
 0x3e2   : > { %p937_p8 = pneg %p936_p7 }
 0x3e3   : > { %p943_p13 = por %p942_p12, %p941_p11 }
 0x3e5   : > { %p944_p0 = pnand %p943_p13, %p937_p8 }
 0x3e7   : > { %947 = shalt.err (!%p944_p0)
}
 0x3e8   : > { %s987_s17 = smov 128  }
 0x3e9   : > { %877 = dma.vmem_to_hbm [thread:$0]  (%p1056_p5), %s1218_s15, 256, %s1223_s26, %s1226_s30, %s987_s17, %s987_s17, %s984_s16  }
 0x3ea PF: > { %p883_p1 = scmp.ge.s32.totalorder %s982_s21, 2  ;;  %s761_s23 = sand.u32 1, %s970_s18  }
 0x3eb   : > { %s762_s25 = scalar_lea.sflag [#allocation3], %s761_s23 }
 0x3ec   : > { %p880_p2 = pnand %p883_p1, %p1060_p6 }
 0x3ee   : > { %965 = dma.done.wait (!%p880_p2), %s762_s25, 256  }
 0x3ef   : > { %967 = vsyncadd (!%p880_p2), %s762_s25, 4294967040  ;;  %p15_p3 = scmp.ge.s32.totalorder %s1043_s24, 4   ;;  %s1276_s18 = smov %s974_s19 }
 0x3f0   : > { %s1277_s19 = smov %s978_s20  ;;  %s1278_s20 = smov %s1054_s27 }
 0x3f1   : > { %s1279_s21 = smov %s1043_s24  ;;  %17 = sbr.rel (!%p15_p3) target bundleno = 3 (0x3), region = 75 }
 0x3f8   :  { %767 = vsyncpa [#allocation3], 1 }
 0x3f9   :  { %769 = vsyncpa [#allocation3 + $0x1], 1 }

</bundles_post_ra>
